<compile_context>
chip_gen: v5e
topology: v5e:2x2
jax: 0.10.0
libtpu: 0.0.40
codegen_flags: <defaults>
</compile_context>

<pallas_src>
import functools

import numpy as np
import jax
import jax.numpy as jnp
from jax.experimental import pallas as pl
from jax.experimental.pallas import tpu as pltpu


# ----------------------------------------------------------------------------- utils
def _round_up(x, m):
    return (x + m - 1) // m * m


def _row_tile(M, C):
    """Row tile for (M, C) elementwise/norm kernels: big, but bounded vreg footprint."""
    tm = max(8, min(512, (262144 // max(C, 1)) // 8 * 8))
    return min(tm, _round_up(M, 8))


# --------------------------------------------------------------- Pallas: matmul (MXU)
def _mm_kernel(a_ref, b_ref, o_ref):
    o_ref[...] = jnp.dot(a_ref[...], b_ref[...], preferred_element_type=jnp.float32)


def _mm_kacc_kernel(a_ref, b_ref, o_ref, acc_ref):
    @pl.when(pl.program_id(1) == 0)
    def _():
        acc_ref[...] = jnp.zeros_like(acc_ref)

    acc_ref[...] += jnp.dot(a_ref[...], b_ref[...], preferred_element_type=jnp.float32)

    @pl.when(pl.program_id(1) == pl.num_programs(1) - 1)
    def _():
        o_ref[...] = acc_ref[...]


@functools.lru_cache(maxsize=None)
def _mm_single_call(Mp, K, N, tm):
    f = pl.pallas_call(
        _mm_kernel,
        out_shape=jax.ShapeDtypeStruct((Mp, N), jnp.float32),
        grid=(Mp // tm,),
        in_specs=[pl.BlockSpec((tm, K), lambda i: (i, 0)),
                  pl.BlockSpec((K, N), lambda i: (0, 0))],   # weight stays resident
        out_specs=pl.BlockSpec((tm, N), lambda i: (i, 0)),
        compiler_params=pltpu.CompilerParams(dimension_semantics=("parallel",)),
    )
    return jax.jit(f)


@functools.lru_cache(maxsize=None)
def _mm_kblocked_call(Mp, K, N, tm, tk):
    f = pl.pallas_call(
        _mm_kacc_kernel,
        out_shape=jax.ShapeDtypeStruct((Mp, N), jnp.float32),
        grid=(Mp // tm, K // tk),
        in_specs=[pl.BlockSpec((tm, tk), lambda i, k: (i, k)),
                  pl.BlockSpec((tk, N), lambda i, k: (k, 0))],
        out_specs=pl.BlockSpec((tm, N), lambda i, k: (i, 0)),
        scratch_shapes=[pltpu.VMEM((tm, N), jnp.float32)],
        compiler_params=pltpu.CompilerParams(
            dimension_semantics=("parallel", "arbitrary")),
    )
    return jax.jit(f)


_FULLK_MAX_K = 8192                    # full-K fast path only below this K
_FULLK_MAX_B_BYTES = 4 * 1024 * 1024   # ... and only if the weight block is <= 4 MiB


def pallas_matmul(a, b):
    """(M, K) @ (K, N) -> (M, N) f32; bf16 operands, f32 MXU accumulation."""
    M, K = a.shape
    K2, N = b.shape
    assert K == K2
    if K < 8:   # degenerate contraction (Cin=1 pointwise conv); not worth the MXU
        return jnp.dot(a.astype(jnp.float32), b.astype(jnp.float32))
    a = a.astype(jnp.bfloat16)
    b = b.astype(jnp.bfloat16)
    tm = min(512, _round_up(M, 8))
    Mp = _round_up(M, tm)
    if Mp != M:
        a = jnp.pad(a, ((0, Mp - M), (0, 0)))
    if K <= _FULLK_MAX_K and K * N * 2 <= _FULLK_MAX_B_BYTES:
        out = _mm_single_call(Mp, K, N, tm)(a, b)
    else:
        tk = None
        for cand in (2048, 1536, 1024, 768, 512, 384, 256, 128):
            if cand <= K and K % cand == 0:
                tk = cand
                break
        if tk is None:                  # no friendly divisor: pad K (operands are small)
            tk = 512
            Kp = _round_up(K, tk)
            a = jnp.pad(a, ((0, 0), (0, Kp - K)))
            b = jnp.pad(b, ((0, Kp - K), (0, 0)))
            K = Kp
        out = _mm_kblocked_call(Mp, K, N, tm, tk)(a, b)
    return out[:M] if Mp != M else out


def linear(x2d, w_t, bias=None):
    """nn.Linear with a pre-transposed (in, out) bf16 weight."""
    y = pallas_matmul(x2d, w_t)
    if bias is not None:
        y = y + bias
    return y


# ------------------------------------------------------------------ Pallas: layer norm
def _ln_kernel(x_ref, w_ref, b_ref, o_ref, *, eps):
    x = x_ref[...]
    mu = jnp.mean(x, axis=-1, keepdims=True)
    var = jnp.mean(jnp.square(x - mu), axis=-1, keepdims=True)
    y = (x - mu) * jax.lax.rsqrt(var + eps)
    o_ref[...] = y * w_ref[...] + b_ref[...]


@functools.lru_cache(maxsize=None)
def _ln_call(Mp, C, tm, eps):
    f = pl.pallas_call(
        functools.partial(_ln_kernel, eps=eps),
        out_shape=jax.ShapeDtypeStruct((Mp, C), jnp.float32),
        grid=(Mp // tm,),
        in_specs=[pl.BlockSpec((tm, C), lambda i: (i, 0)),
                  pl.BlockSpec((1, C), lambda i: (0, 0)),
                  pl.BlockSpec((1, C), lambda i: (0, 0))],
        out_specs=pl.BlockSpec((tm, C), lambda i: (i, 0)),
        compiler_params=pltpu.CompilerParams(dimension_semantics=("parallel",)),
    )
    return jax.jit(f)


def pallas_layernorm(x2d, weight=None, bias=None, eps=1e-5):
    M, C = x2d.shape
    if weight is None:
        weight = jnp.ones((C,), jnp.float32)
    if bias is None:
        bias = jnp.zeros((C,), jnp.float32)
    tm = _row_tile(M, C)
    Mp = _round_up(M, tm)
    x_p = x2d.astype(jnp.float32)
    if Mp != M:
        x_p = jnp.pad(x_p, ((0, Mp - M), (0, 0)))
    out = _ln_call(Mp, C, tm, float(eps))(
        x_p, weight.reshape(1, C).astype(jnp.float32),
        bias.reshape(1, C).astype(jnp.float32))
    return out[:M] if Mp != M else out


# --------------------------------------------- Pallas: instance norm (+fused LeakyReLU)
def _affine_act_kernel(x_ref, a_ref, b_ref, o_ref, *, slope):
    y = x_ref[...] * a_ref[...] + b_ref[...]
    o_ref[...] = jnp.where(y >= 0.0, y, y * slope)


@functools.lru_cache(maxsize=None)
def _affine_act_call(Mp, C, tm, slope):
    f = pl.pallas_call(
        functools.partial(_affine_act_kernel, slope=slope),
        out_shape=jax.ShapeDtypeStruct((Mp, C), jnp.float32),
        grid=(Mp // tm,),
        in_specs=[pl.BlockSpec((tm, C), lambda i: (i, 0)),
                  pl.BlockSpec((1, C), lambda i: (0, 0)),
                  pl.BlockSpec((1, C), lambda i: (0, 0))],
        out_specs=pl.BlockSpec((tm, C), lambda i: (i, 0)),
        compiler_params=pltpu.CompilerParams(dimension_semantics=("parallel",)),
    )
    return jax.jit(f)


@functools.partial(jax.jit, static_argnames=("eps",))
def _instance_stats(x2d, eps=1e-5):
    mu = jnp.mean(x2d, axis=0, keepdims=True)
    var = jnp.mean(jnp.square(x2d), axis=0, keepdims=True) - jnp.square(mu)
    a = jax.lax.rsqrt(var + eps)
    return a, -mu * a


def pallas_instance_norm(x, eps=1e-5, leaky_slope=None):
    """InstanceNorm3d(affine=False) (+ optional fused LeakyReLU), channels-last NDHWC."""
    n, d, h, w, c = x.shape
    s = d * h * w
    slope = 1.0 if leaky_slope is None else float(leaky_slope)
    tm = _row_tile(s, c)
    Sp = _round_up(s, tm)
    outs = []
    for i in range(n):
        x2 = x[i].reshape(s, c).astype(jnp.float32)
        a, b = _instance_stats(x2, eps=float(eps))
        xp = x2 if Sp == s else jnp.pad(x2, ((0, Sp - s), (0, 0)))
        y = _affine_act_call(Sp, c, tm, slope)(xp, a, b)
        outs.append((y[:s] if Sp != s else y).reshape(d, h, w, c))
    return jnp.stack(outs, axis=0)


# ---------------------------------------------------- Pallas: fused window attention
def _attn_body(q_ref, k_ref, v_ref, bias_ref, mask, o_ref, nheads, scale):
    outs = []
    for hh in range(nheads):
        q = q_ref[0, hh]                                   # (N, Dh) bf16
        k = k_ref[0, hh]
        v = v_ref[0, hh]
        s = jax.lax.dot_general(q, k, (((1,), (1,)), ((), ())),
                                preferred_element_type=jnp.float32) * scale
        s = s + bias_ref[hh]
        if mask is not None:
            s = s + mask
        s = s - jnp.max(s, axis=-1, keepdims=True)
        p = jnp.exp(s)
        p = p * pl.reciprocal(jnp.sum(p, axis=-1, keepdims=True), approx=True)
        outs.append(jnp.dot(p.astype(jnp.bfloat16), v,
                            preferred_element_type=jnp.float32))
    o_ref[0] = jnp.concatenate(outs, axis=-1)              # lane-dense (N, H*Dh) store


def _attn_kernel(q_ref, k_ref, v_ref, bias_ref, o_ref, *, nheads, scale):
    _attn_body(q_ref, k_ref, v_ref, bias_ref, None, o_ref, nheads, scale)


def _attn_mask_kernel(q_ref, k_ref, v_ref, bias_ref, mask_ref, o_ref, *, nheads, scale):
    _attn_body(q_ref, k_ref, v_ref, bias_ref, mask_ref[0], o_ref, nheads, scale)


@functools.lru_cache(maxsize=None)
def _attn_call(B_, H, N, Dh, nW, scale, masked):
    C = H * Dh
    kern = functools.partial(_attn_mask_kernel if masked else _attn_kernel,
                             nheads=H, scale=scale)
    in_specs = [pl.BlockSpec((1, H, N, Dh), lambda b: (b, 0, 0, 0)),
                pl.BlockSpec((1, H, N, Dh), lambda b: (b, 0, 0, 0)),
                pl.BlockSpec((1, H, N, Dh), lambda b: (b, 0, 0, 0)),
                pl.BlockSpec((H, N, N), lambda b: (0, 0, 0))]   # bias stays resident
    if masked:
        in_specs.append(pl.BlockSpec((1, N, N), lambda b: (b % nW, 0, 0)))
    f = pl.pallas_call(
        kern,
        out_shape=jax.ShapeDtypeStruct((B_, N, C), jnp.float32),
        grid=(B_,),
        in_specs=in_specs,
        out_specs=pl.BlockSpec((1, N, C), lambda b: (b, 0, 0)),
        compiler_params=pltpu.CompilerParams(dimension_semantics=("parallel",)),
    )
    return jax.jit(f)


# ----------------------------------------------------------------- convolutions (glue)
# TODO(synk): replace im2col with a halo-DMA fused conv kernel (27 accumulated taps)
# to remove the remaining 27x patch materialization; patches are built in bf16 with a
# single pad pass for now.
def _im2col_3d(x, k, stride, pad):
    n, d, h, w, c = x.shape
    if pad:
        x = jnp.pad(x, ((0, 0), (pad, pad), (pad, pad), (pad, pad), (0, 0)))
    do = (d + 2 * pad - k) // stride + 1
    ho = (h + 2 * pad - k) // stride + 1
    wo = (w + 2 * pad - k) // stride + 1
    cols = []
    for dz in range(k):
        for dy in range(k):
            for dx in range(k):
                cols.append(x[:, dz:dz + do * stride:stride,
                              dy:dy + ho * stride:stride,
                              dx:dx + wo * stride:stride, :])
    patches = jnp.stack(cols, axis=-2)                      # (N, Do, Ho, Wo, k^3, C)
    return patches.reshape(n, do * ho * wo, k * k * k * c), (do, ho, wo)


def conv3d(x, w2, cout, k, bias=None, stride=1, pad=0):
    """x: (N,D,H,W,C) channels-last; w2: pre-reshaped (k^3*Cin, Cout) bf16 weight."""
    n = x.shape[0]
    cin = x.shape[-1]
    xb = x.astype(jnp.bfloat16)
    if k == 1 and stride == 1:
        y = pallas_matmul(xb.reshape(-1, cin), w2).reshape(x.shape[:-1] + (cout,))
    else:
        patches, (do, ho, wo) = _im2col_3d(xb, k, stride, pad)
        y = pallas_matmul(patches.reshape(-1, k * k * k * cin), w2)
        y = y.reshape(n, do, ho, wo, cout)
    if bias is not None:
        y = y + bias
    return y


def conv_transpose3d_k2s2(x, w2, cout):
    """ConvTranspose3d(k=2, s=2, bias=False); w2 pre-reshaped (Cin, 8*Cout) bf16."""
    n, d, h, w, cin = x.shape
    y = pallas_matmul(x.astype(jnp.bfloat16).reshape(-1, cin), w2)
    y = y.reshape(n, d, h, w, 2, 2, 2, cout)
    y = jnp.transpose(y, (0, 1, 4, 2, 5, 3, 6, 7)).reshape(n, 2 * d, 2 * h, 2 * w, cout)
    return y


# -------------------------------------------------------------- dynunet-style blocks
def leaky_relu(x, slope=0.01):
    return jnp.where(x >= 0.0, x, slope * x)


def unet_res_block(x, p):
    """MONAI UnetResBlock (k=3, s=1, instance norm, LeakyReLU 0.01)."""
    residual = x
    out = conv3d(x, p["conv1_w2"], p["conv1_cout"], 3, stride=1, pad=1)
    out = pallas_instance_norm(out, leaky_slope=0.01)       # norm1 + LeakyReLU fused
    out = conv3d(out, p["conv2_w2"], p["conv2_cout"], 3, stride=1, pad=1)
    out = pallas_instance_norm(out)                         # norm2
    if "conv3_w2" in p:
        residual = conv3d(residual, p["conv3_w2"], p["conv3_cout"], 1, stride=1, pad=0)
        residual = pallas_instance_norm(residual)           # norm3
    return leaky_relu(out + residual)


def unetr_up_block(x, skip, p):
    out = conv_transpose3d_k2s2(x, p["transp_w2"], p["transp_cout"])
    out = jnp.concatenate([out, skip], axis=-1)
    return unet_res_block(out, p["res"])


# ------------------------------------------------------------------- Swin components
WINDOW_SIZE = (7, 7, 7)
DEPTHS = (2, 2, 2, 2)
NUM_HEADS = (3, 6, 12, 24)
FEATURE_SIZE = 48


def get_window_size(x_size, window_size, shift_size):
    ws = list(window_size)
    ss = list(shift_size)
    for i in range(len(x_size)):
        if x_size[i] <= window_size[i]:
            ws[i] = x_size[i]
            ss[i] = 0
    return tuple(ws), tuple(ss)


def window_partition(x, ws):
    b, d, h, w, c = x.shape
    x = x.reshape(b, d // ws[0], ws[0], h // ws[1], ws[1], w // ws[2], ws[2], c)
    return jnp.transpose(x, (0, 1, 3, 5, 2, 4, 6, 7)).reshape(-1, ws[0] * ws[1] * ws[2], c)


def window_reverse(windows, ws, dims):
    b, d, h, w = dims
    x = windows.reshape(b, d // ws[0], h // ws[1], w // ws[2], ws[0], ws[1], ws[2], -1)
    return jnp.transpose(x, (0, 1, 4, 2, 5, 3, 6, 7)).reshape(b, d, h, w, -1)


def compute_mask(dims, ws, ss):
    d, h, w = dims
    img_mask = np.zeros((1, d, h, w, 1), np.float32)
    cnt = 0
    for d_s in (slice(-ws[0]), slice(-ws[0], -ss[0]), slice(-ss[0], None)):
        for h_s in (slice(-ws[1]), slice(-ws[1], -ss[1]), slice(-ss[1], None)):
            for w_s in (slice(-ws[2]), slice(-ws[2], -ss[2]), slice(-ss[2], None)):
                img_mask[:, d_s, h_s, w_s, :] = cnt
                cnt += 1
    x = img_mask.reshape(1, d // ws[0], ws[0], h // ws[1], ws[1], w // ws[2], ws[2], 1)
    mw = x.transpose(0, 1, 3, 5, 2, 4, 6, 7).reshape(-1, ws[0] * ws[1] * ws[2])
    attn_mask = mw[:, None, :] - mw[:, :, None]
    attn_mask = np.where(attn_mask != 0, -100.0, 0.0).astype(np.float32)
    return jnp.asarray(attn_mask)


def build_relative_position_index(ws):
    coords = np.stack(np.meshgrid(np.arange(ws[0]), np.arange(ws[1]),
                                  np.arange(ws[2]), indexing="ij"))
    cf = coords.reshape(3, -1)
    rel = cf[:, :, None] - cf[:, None, :]
    rel = rel.transpose(1, 2, 0).astype(np.int64)
    rel[:, :, 0] += ws[0] - 1
    rel[:, :, 1] += ws[1] - 1
    rel[:, :, 2] += ws[2] - 1
    rel[:, :, 0] *= (2 * ws[1] - 1) * (2 * ws[2] - 1)
    rel[:, :, 1] *= (2 * ws[2] - 1)
    return rel.sum(-1).astype(np.int32)                     # (343, 343)


REL_POS_INDEX = build_relative_position_index(WINDOW_SIZE)


def window_attention(x_windows, p, num_heads, mask):
    b_, n, c = x_windows.shape
    head_dim = c // num_heads
    qkv = linear(x_windows.reshape(-1, c), p["qkv_wT"], p["qkv_b"])
    qkv = qkv.reshape(b_, n, 3, num_heads, head_dim)
    qkv = jnp.transpose(qkv, (2, 0, 3, 1, 4)).astype(jnp.bfloat16)   # (3, B_, H, N, Dh)
    q, k, v = qkv[0], qkv[1], qkv[2]
    bias = p["rel_bias"][:, :n, :n]                                   # (H, n, n)
    scale = float(head_dim) ** -0.5
    if mask is None:
        o = _attn_call(b_, num_heads, n, head_dim, 1, scale, False)(q, k, v, bias)
    else:
        o = _attn_call(b_, num_heads, n, head_dim, int(mask.shape[0]), scale, True)(
            q, k, v, bias, mask)
    o = linear(o.reshape(-1, c), p["proj_wT"], p["proj_b"])
    return o.reshape(b_, n, c)


def swin_block(x, p, num_heads, shift_size, attn_mask):
    b, d, h, w, c = x.shape
    ws, ss = get_window_size((d, h, w), WINDOW_SIZE, shift_size)
    shortcut = x
    # --- part 1: LN -> (shifted) window attention
    xn = pallas_layernorm(x.reshape(-1, c), p["norm1_w"], p["norm1_b"]).reshape(b, d, h, w, c)
    pad_d = (ws[0] - d % ws[0]) % ws[0]
    pad_h = (ws[1] - h % ws[1]) % ws[1]
    pad_w = (ws[2] - w % ws[2]) % ws[2]
    if pad_d or pad_h or pad_w:
        xn = jnp.pad(xn, ((0, 0), (0, pad_d), (0, pad_h), (0, pad_w), (0, 0)))
    _, dp, hp, wp, _ = xn.shape
    if any(i > 0 for i in ss):
        shifted = jnp.roll(xn, shift=(-ss[0], -ss[1], -ss[2]), axis=(1, 2, 3))
        mask = attn_mask
    else:
        shifted = xn
        mask = None
    x_windows = window_partition(shifted, ws)
    attn_windows = window_attention(x_windows, p, num_heads, mask)
    shifted = window_reverse(attn_windows, ws, (b, dp, hp, wp))
    if any(i > 0 for i in ss):
        xn = jnp.roll(shifted, shift=(ss[0], ss[1], ss[2]), axis=(1, 2, 3))
    else:
        xn = shifted
    if pad_d or pad_h or pad_w:
        xn = xn[:, :d, :h, :w, :]
    x = shortcut + xn
    # --- part 2: LN -> MLP (GELU)
    xn2 = pallas_layernorm(x.reshape(-1, c), p["norm2_w"], p["norm2_b"])
    hdn = linear(xn2, p["fc1_wT"], p["fc1_b"])
    hdn = jax.nn.gelu(hdn, approximate=False)
    out = linear(hdn, p["fc2_wT"], p["fc2_b"])
    return x + out.reshape(b, d, h, w, c)


def patch_merging(x, p):
    b, d, h, w, c = x.shape
    # NOTE: replicates MONAI PatchMerging (v1) slice ordering as-is (incl. duplicates).
    x0 = x[:, 0::2, 0::2, 0::2, :]
    x1 = x[:, 1::2, 0::2, 0::2, :]
    x2 = x[:, 0::2, 1::2, 0::2, :]
    x3 = x[:, 0::2, 0::2, 1::2, :]
    x4 = x[:, 1::2, 0::2, 1::2, :]
    x5 = x[:, 0::2, 1::2, 0::2, :]
    x6 = x[:, 0::2, 0::2, 1::2, :]
    x7 = x[:, 1::2, 1::2, 1::2, :]
    xc = jnp.concatenate([x0, x1, x2, x3, x4, x5, x6, x7], axis=-1)
    xf = xc.reshape(-1, 8 * c)
    xf = pallas_layernorm(xf, p["norm_w"], p["norm_b"])
    xf = pallas_matmul(xf, p["red_wT"])                     # Linear(8c -> 2c), no bias
    return xf.reshape(b, d // 2, h // 2, w // 2, 2 * c)


def basic_layer(x, layer_params, num_heads):
    b, d, h, w, c = x.shape
    ws, ss = get_window_size((d, h, w), WINDOW_SIZE, tuple(i // 2 for i in WINDOW_SIZE))
    dp = int(np.ceil(d / ws[0])) * ws[0]
    hp = int(np.ceil(h / ws[1])) * ws[1]
    wp = int(np.ceil(w / ws[2])) * ws[2]
    attn_mask = compute_mask((dp, hp, wp), ws, ss) if any(s > 0 for s in ss) else None
    for i, bp in enumerate(layer_params["blocks"]):
        shift = (0, 0, 0) if i % 2 == 0 else tuple(s // 2 for s in WINDOW_SIZE)
        x = swin_block(x, bp, num_heads, shift, attn_mask)
    return patch_merging(x, layer_params["merge"])


def proj_out(x):
    """F.layer_norm over channels, no affine (SwinTransformer.proj_out, normalize=True)."""
    b, d, h, w, c = x.shape
    return pallas_layernorm(x.reshape(-1, c)).reshape(b, d, h, w, c)


def swin_vit(x, S):
    x0 = conv3d(x, S["patch_embed_w2"], FEATURE_SIZE, 2,
                bias=S["patch_embed_b"], stride=2, pad=0)
    x0_out = proj_out(x0)
    x1 = basic_layer(x0, S["layers"][0], NUM_HEADS[0])
    x1_out = proj_out(x1)
    x2 = basic_layer(x1, S["layers"][1], NUM_HEADS[1])
    x2_out = proj_out(x2)
    x3 = basic_layer(x2, S["layers"][2], NUM_HEADS[2])
    x3_out = proj_out(x3)
    x4 = basic_layer(x3, S["layers"][3], NUM_HEADS[3])
    x4_out = proj_out(x4)
    return [x0_out, x1_out, x2_out, x3_out, x4_out]


# ---------------------------------------------------------------------- full forward
def swin_unetr_forward(x_ncdhw, P):
    x = jnp.transpose(x_ncdhw.astype(jnp.float32), (0, 2, 3, 4, 1))   # NCDHW -> NDHWC
    hidden = swin_vit(x, P["swin"])
    enc0 = unet_res_block(x, P["encoder1"])
    enc1 = unet_res_block(hidden[0], P["encoder2"])
    enc2 = unet_res_block(hidden[1], P["encoder3"])
    enc3 = unet_res_block(hidden[2], P["encoder4"])
    dec4 = unet_res_block(hidden[4], P["encoder10"])
    dec3 = unetr_up_block(dec4, hidden[3], P["decoder5"])
    dec2 = unetr_up_block(dec3, enc3, P["decoder4"])
    dec1 = unetr_up_block(dec2, enc2, P["decoder3"])
    dec0 = unetr_up_block(dec1, enc1, P["decoder2"])
    out = unetr_up_block(dec0, enc0, P["decoder1"])
    logits = conv3d(out, P["out_w2"], 12, 1, bias=P["out_b"])          # 1x1x1 conv
    logits = jnp.transpose(logits, (0, 4, 1, 2, 3))                    # back to NCDHW
    return (logits,)                                                   # tuple_output=True


# ------------------------------------------------------------- deterministic parameters
def init_params(key):
    fs = FEATURE_SIZE
    kit = iter(jax.random.split(key, 512))

    def nrm(shape, std=0.02):
        return jax.random.normal(next(kit), shape, jnp.float32) * std

    def zeros(shape):
        return jnp.zeros(shape, jnp.float32)

    def ones(shape):
        return jnp.ones(shape, jnp.float32)

    P = {}
    swin = {"patch_embed_w": nrm((fs, 1, 2, 2, 2)), "patch_embed_b": zeros((fs,))}
    n_bias = (2 * WINDOW_SIZE[0] - 1) * (2 * WINDOW_SIZE[1] - 1) * (2 * WINDOW_SIZE[2] - 1)
    layers = []
    for i in range(4):
        dim = fs * (2 ** i)
        blocks = []
        for _ in range(DEPTHS[i]):
            blocks.append(dict(
                norm1_w=ones((dim,)), norm1_b=zeros((dim,)),
                qkv_w=nrm((3 * dim, dim)), qkv_b=zeros((3 * dim,)),
                rel_bias_table=nrm((n_bias, NUM_HEADS[i])),
                proj_w=nrm((dim, dim)), proj_b=zeros((dim,)),
                norm2_w=ones((dim,)), norm2_b=zeros((dim,)),
                fc1_w=nrm((4 * dim, dim)), fc1_b=zeros((4 * dim,)),
                fc2_w=nrm((dim, 4 * dim)), fc2_b=zeros((dim,)),
            ))
        merge = dict(norm_w=ones((8 * dim,)), norm_b=zeros((8 * dim,)),
                     red_w=nrm((2 * dim, 8 * dim)))
        layers.append(dict(blocks=blocks, merge=merge))
    swin["layers"] = layers
    P["swin"] = swin

    def res_block(cin, cout):
        p = dict(conv1_w=nrm((cout, cin, 3, 3, 3)), conv2_w=nrm((cout, cout, 3, 3, 3)))
        if cin != cout:
            p["conv3_w"] = nrm((cout, cin, 1, 1, 1))
        return p

    P["encoder1"] = res_block(1, fs)
    P["encoder2"] = res_block(fs, fs)
    P["encoder3"] = res_block(2 * fs, 2 * fs)
    P["encoder4"] = res_block(4 * fs, 4 * fs)
    P["encoder10"] = res_block(16 * fs, 16 * fs)

    def up_block(cin, cout):
        return dict(transp_w=nrm((cin, cout, 2, 2, 2)), res=res_block(2 * cout, cout))

    P["decoder5"] = up_block(16 * fs, 8 * fs)
    P["decoder4"] = up_block(8 * fs, 4 * fs)
    P["decoder3"] = up_block(4 * fs, 2 * fs)
    P["decoder2"] = up_block(2 * fs, fs)
    P["decoder1"] = up_block(fs, fs)

    P["out_w"] = nrm((12, fs, 1, 1, 1))
    P["out_b"] = zeros((12,))
    return P


def prepare_params(P):
    """One-time conversion of torch-layout params to kernel layouts (bf16, pre-transposed,
    conv weights reshaped for matmul, relative-position bias pre-gathered)."""
    def bf(a):
        return a.astype(jnp.bfloat16)

    def conv_w2(w):                                         # (Cout,Cin,k,k,k)->(k^3*Cin,Cout)
        cout, cin, k = w.shape[0], w.shape[1], w.shape[2]
        return bf(jnp.transpose(w, (2, 3, 4, 1, 0)).reshape(k * k * k * cin, cout))

    def lin_wT(w):                                          # (out,in)->(in,out)
        return bf(jnp.transpose(w))

    Q = {}
    swin = P["swin"]
    S = {"patch_embed_w2": conv_w2(swin["patch_embed_w"]),
         "patch_embed_b": swin["patch_embed_b"]}
    idx = REL_POS_INDEX.reshape(-1)
    layers = []
    for layer in swin["layers"]:
        blocks = []
        for bp in layer["blocks"]:
            tbl = bp["rel_bias_table"]                      # (n_bias, H)
            H = tbl.shape[1]
            bias = tbl[idx].reshape(343, 343, H)
            bias = jnp.transpose(bias, (2, 0, 1)).astype(jnp.float32)
            blocks.append(dict(
                norm1_w=bp["norm1_w"], norm1_b=bp["norm1_b"],
                qkv_wT=lin_wT(bp["qkv_w"]), qkv_b=bp["qkv_b"],
                rel_bias=bias,
                proj_wT=lin_wT(bp["proj_w"]), proj_b=bp["proj_b"],
                norm2_w=bp["norm2_w"], norm2_b=bp["norm2_b"],
                fc1_wT=lin_wT(bp["fc1_w"]), fc1_b=bp["fc1_b"],
                fc2_wT=lin_wT(bp["fc2_w"]), fc2_b=bp["fc2_b"]))
        merge = dict(norm_w=layer["merge"]["norm_w"], norm_b=layer["merge"]["norm_b"],
                     red_wT=lin_wT(layer["merge"]["red_w"]))
        layers.append(dict(blocks=blocks, merge=merge))
    S["layers"] = layers
    Q["swin"] = S

    def prep_res(p):
        q = dict(conv1_w2=conv_w2(p["conv1_w"]), conv1_cout=int(p["conv1_w"].shape[0]),
                 conv2_w2=conv_w2(p["conv2_w"]), conv2_cout=int(p["conv2_w"].shape[0]))
        if "conv3_w" in p:
            q["conv3_w2"] = conv_w2(p["conv3_w"])
            q["conv3_cout"] = int(p["conv3_w"].shape[0])
        return q

    for name in ("encoder1", "encoder2", "encoder3", "encoder4", "encoder10"):
        Q[name] = prep_res(P[name])

    def prep_up(p):
        w = p["transp_w"]                                   # (Cin, Cout, 2, 2, 2)
        cin, cout = int(w.shape[0]), int(w.shape[1])
        w2 = bf(jnp.transpose(w, (0, 2, 3, 4, 1)).reshape(cin, 8 * cout))
        return dict(transp_w2=w2, transp_cout=cout, res=prep_res(p["res"]))

    for name in ("decoder5", "decoder4", "decoder3", "decoder2", "decoder1"):
        Q[name] = prep_up(P[name])

    Q["out_w2"] = conv_w2(P["out_w"])
    Q["out_b"] = P["out_b"]
    return Q


# ----------------------------------------------------------------------------- main
if __name__ == "__main__":
    key = jax.random.PRNGKey(0)
    pkey, xkey = jax.random.split(key)
    params = init_params(pkey)
    prepped = prepare_params(params)

    # Smallest volume the architecture supports (spatial dims must be divisible by 32:
    # patch-embed stride 2 followed by 4 patch-merging stages).
    x = jax.random.normal(xkey, (1, 1, 32, 32, 32), jnp.float32)

    out = swin_unetr_forward(x, prepped)
    out = jax.block_until_ready(out)

    assert isinstance(out, tuple) and len(out) == 1
    assert out[0].shape == (1, 12, 32, 32, 32)
    assert out[0].dtype == jnp.float32
    assert bool(jnp.all(jnp.isfinite(out[0])))
    print("KERNEL_OK")
</pallas_src>

<mosaic_0001>
module attributes {stable_mosaic.version = 11 : i64} {
  func.func @_mm_kernel(%arg0: i32, %arg1: memref<512x8xbf16, #tpu.memory_space<vmem>>, %arg2: memref<8x48xbf16, #tpu.memory_space<vmem>>, %arg3: memref<512x48xf32, #tpu.memory_space<vmem>>) attributes {dimension_semantics = [#tpu.dimension_semantics<parallel>], iteration_bounds = array<i64: 8>, scalar_prefetch = 0 : i64, scratch_operands = 0 : i64, tpu.core_type = #tpu.core_type<tc>, window_params = [{transform_indices = @transform_0, window_bounds = array<i64: 512, 8>}, {pipeline_mode = #tpu.pipeline_mode<synchronous>, transform_indices = @transform_1, window_bounds = array<i64: 8, 48>}, {transform_indices = @transform_2, window_bounds = array<i64: 512, 48>}]} {
    %c0 = arith.constant 0 : index
    %c0_0 = arith.constant 0 : index
    %0 = vector.load %arg1[%c0, %c0_0] : memref<512x8xbf16, #tpu.memory_space<vmem>>, vector<512x8xbf16>
    %c0_1 = arith.constant 0 : index
    %c0_2 = arith.constant 0 : index
    %1 = vector.load %arg2[%c0_1, %c0_2] : memref<8x48xbf16, #tpu.memory_space<vmem>>, vector<8x48xbf16>
    %cst = arith.constant dense<0.000000e+00> : vector<512x48xf32>
    %2 = tpu.matmul %0, %1, %cst {dimension_numbers = #tpu.dot_dimension_numbers<[1], [0], [0], [1], [0, 0, 1, 1], [], []>} : vector<512x8xbf16>, vector<8x48xbf16>, vector<512x48xf32> -> vector<512x48xf32>
    %c0_3 = arith.constant 0 : index
    %c0_4 = arith.constant 0 : index
    %3 = vector.load %arg3[%c0_3, %c0_4] : memref<512x48xf32, #tpu.memory_space<vmem>>, vector<512x48xf32>
    tpu.vector_store %arg3[%c0_3, %c0_4], %2 {strides = array<i32>} : memref<512x48xf32, #tpu.memory_space<vmem>>, vector<512x48xf32>,
    return
  }
  func.func @transform_0(%arg0: i32) -> (i32, i32) {
    %c0_i32 = arith.constant 0 : i32
    %c0_i32_0 = arith.constant 0 : i32
    return %arg0, %c0_i32 : i32, i32
  }
  func.func @transform_1(%arg0: i32) -> (i32, i32) {
    %c0_i32 = arith.constant 0 : i32
    %c0_i32_0 = arith.constant 0 : i32
    %c0_i32_1 = arith.constant 0 : i32
    return %c0_i32, %c0_i32_0 : i32, i32
  }
  func.func @transform_2(%arg0: i32) -> (i32, i32) {
    %c0_i32 = arith.constant 0 : i32
    %c0_i32_0 = arith.constant 0 : i32
    return %arg0, %c0_i32 : i32, i32
  }
}

</mosaic_0001>

<bundles_post_ra>
// kernel: tpu_custom_call.1
= control target key start
LH: loop header
LB: loop body
LE: loop exit
PB: predicated region body
PF: predicated region fallthrough
CT: control target
= control target key end

     0   :  { %7 = vsyncpa [#allocation3], 0  ;;  %s1076_s9 = smov 0   ;;  %s1296_s0 = inlined_call_operand.vmem [shape: bf16[4096,8], index: 0, kind: input, shape index: {}]   ;;  %s1297_s1 = inlined_call_operand.hbm [shape: bf16[8,48], index: 1, kind: input, shape index: {}]   ;;  %s1298_s2 = inlined_call_operand.vmem [shape: f32[4096,48], index: 2, kind: output, shape index: {}]  }
   0x1 LB: > { %s791_s10 = sadd.s32 4294967295, %s1058_s9   ;;  %p793_p0 = scmp.ge.s32.totalorder %s1058_s9, 1  ;;  %s1058_s9 = sphi %s1076_s9, %s13_s9  }
   0x2   : > { %p91_p1 = scmp.lt.s32.totalorder %s1058_s9, 9  ;;  %s103_s13 = sshll.u32 %s1297_s1, 4  ;;  %s104_s13 = int_to_ptr.hbm [resolvable:$true] %s103_s13 }
   0x3   : > { %p1007_p3 = scmp.eq.s32.totalorder %s791_s10, 0  ;;  %s1060_s14 = smov [#allocation2]  }
   0x4   : > { %p92_p2 = pnand %p793_p0, %p91_p1  ;;  %s105_s15 = sshll.u32 %s1060_s14, 4  ;;  %s106_s15 = int_to_ptr.vmem [resolvable:$true] %s105_s15 }
   0x6   : > { %p1003_p4 = pneg %p92_p2  ;;  %127 = sbr.rel (%p92_p2) target bundleno = 275 (0x113), region = 28 }
   0x8   : > { %p1004_p5 = pnand %p1007_p3, %p1003_p4 }
   0xa   : > { %1006 = dma.hbm_to_vmem [thread:$0]  (!%p1004_p5), %s104_s13, 64, %s106_s15, [#allocation3]  }
   0xb   : > { %1053 = dma.done.wait (%p1007_p3), [#allocation3], 64  }
   0xc   : > { %1055 = vsyncadd (%p1007_p3), [#allocation3], 4294967232  ;;  %s798_s16 = sshll.u32 %s791_s10, 6  ;;  %vm485_vm0 = vcmask 1043456   ;;  %v227_v0 = vld [vmem:[#allocation2] sm:$0xf] }
   0xd   : > { %p151_p6 = scmp.lt.s32.totalorder %s798_s16, 511  ;;  %v487_v1 = vsel %vm485_vm0, %v227_v0, 0  ;;  %vm388_vm1 = vcmask 64512   ;;  %vm658_vm2 = vcmask 392192  }
   0xe   : > { %496 = vmatpush.bf16.msra.mxu0 %v487_v1  ;;  %996 = vmatpush.bf16.msra.mxu1 %v487_v1 }
   0xf   : > { %s1300_s16 = smov (!%p151_p6, %s798_s16), 511  ;;  %997 = vmatpush.bf16.msra.mxu2 %v487_v1  ;;  %998 = vmatpush.bf16.msra.mxu3 %v487_v1 }
  0x10   : > { %s799_s17 = sshll.u32 %s1300_s16, 2  ;;  %s801_s21 = sshll.u32 %s1300_s16, 3 }
  0x11   : > { %s1093_s20 = scalar_lea.vmem %s1296_s0, %s799_s17  ;;  %s1163_s24 = scalar_lea.vmem %s1298_s2, %s801_s21 }
  0x12   : > { %v964_v2 = vld [vmem:[%s1093_s20] sm:$0xff]  ;;  %v965_v6 = vld [vmem:[%s1093_s20 + $0x8] sm:$0xff]  ;;  %v966_v10 = vld [vmem:[%s1093_s20 + $0x10] sm:$0xff] }
  0x13   : > { %v972_v3 = vld [vmem:[%s1093_s20 + $0x40] sm:$0xff]  ;;  %930 = vmatmul.msk.bf16.vlgmr.msra.gmra.mxu0 %vm388_vm1, %v964_v2  ;;  %v973_v7 = vld [vmem:[%s1093_s20 + $0x48] sm:$0xff]  ;;  %v974_v11 = vld [vmem:[%s1093_s20 + $0x50] sm:$0xff] }
  0x14   : > { %v980_v4 = vld [vmem:[%s1093_s20 + $0x80] sm:$0xff]  ;;  %938 = vmatmul.msk.bf16.vlgmr.msra.gmra.mxu1 %vm388_vm1, %v972_v3  ;;  %v981_v8 = vld [vmem:[%s1093_s20 + $0x88] sm:$0xff]  ;;  %v982_v12 = vld [vmem:[%s1093_s20 + $0x90] sm:$0xff] }
  0x15   : > { %v988_v5 = vld [vmem:[%s1093_s20 + $0xc0] sm:$0xff]  ;;  %946 = vmatmul.msk.bf16.vlgmr.msra.gmra.mxu2 %vm388_vm1, %v980_v4  ;;  %v989_v9 = vld [vmem:[%s1093_s20 + $0xc8] sm:$0xff]  ;;  %v990_v13 = vld [vmem:[%s1093_s20 + $0xd0] sm:$0xff] }
  0x16   : > { %954 = vmatmul.msk.bf16.vlgmr.msra.gmra.mxu3 %vm388_vm1, %v988_v5  ;;  %v967_v14 = vld [vmem:[%s1093_s20 + $0x18] sm:$0xff]  ;;  %v968_v18 = vld [vmem:[%s1093_s20 + $0x20] sm:$0xff]  ;;  %v969_v22 = vld [vmem:[%s1093_s20 + $0x28] sm:$0xff] }
  0x17   : > { %v975_v15 = vld [vmem:[%s1093_s20 + $0x58] sm:$0xff]  ;;  %v976_v19 = vld [vmem:[%s1093_s20 + $0x60] sm:$0xff]  ;;  %v977_v23 = vld [vmem:[%s1093_s20 + $0x68] sm:$0xff] }
  0x18   : > { %v983_v16 = vld [vmem:[%s1093_s20 + $0x98] sm:$0xff]  ;;  %v984_v20 = vld [vmem:[%s1093_s20 + $0xa0] sm:$0xff]  ;;  %v985_v24 = vld [vmem:[%s1093_s20 + $0xa8] sm:$0xff] }
  0x19   : > { %v991_v17 = vld [vmem:[%s1093_s20 + $0xd8] sm:$0xff]  ;;  %v992_v21 = vld [vmem:[%s1093_s20 + $0xe0] sm:$0xff]  ;;  %v993_v25 = vld [vmem:[%s1093_s20 + $0xe8] sm:$0xff] }
  0x1a   : > { %v970_v26 = vld [vmem:[%s1093_s20 + $0x30] sm:$0xff]  ;;  %v971_v30 = vld [vmem:[%s1093_s20 + $0x38] sm:$0xff] }
  0x1b   : > { %v978_v27 = vld [vmem:[%s1093_s20 + $0x70] sm:$0xff]  ;;  %v979_v31 = vld [vmem:[%s1093_s20 + $0x78] sm:$0xff] }
  0x1c   : > { %v986_v28 = vld [vmem:[%s1093_s20 + $0xb0] sm:$0xff]  ;;  %v987_v32 = vld [vmem:[%s1093_s20 + $0xb8] sm:$0xff] }
  0x1d   : > { %v994_v29 = vld [vmem:[%s1093_s20 + $0xf0] sm:$0xff]  ;;  %v995_v33 = vld [vmem:[%s1093_s20 + $0xf8] sm:$0xff] }
  0x23   : > { %931 = vmatmul.msk.bf16.gmra.mxu0 %vm388_vm1, %v965_v6 }
  0x24   : > { %939 = vmatmul.msk.bf16.gmra.mxu1 %vm388_vm1, %v973_v7 }
  0x25   : > { %947 = vmatmul.msk.bf16.gmra.mxu2 %vm388_vm1, %v981_v8 }
  0x26   : > { %955 = vmatmul.msk.bf16.gmra.mxu3 %vm388_vm1, %v989_v9 }
  0x33   : > { %932 = vmatmul.msk.bf16.gmra.mxu0 %vm388_vm1, %v966_v10 }
  0x34   : > { %940 = vmatmul.msk.bf16.gmra.mxu1 %vm388_vm1, %v974_v11 }
  0x35   : > { %948 = vmatmul.msk.bf16.gmra.mxu2 %vm388_vm1, %v982_v12 }
  0x36   : > { %956 = vmatmul.msk.bf16.gmra.mxu3 %vm388_vm1, %v990_v13 }
  0x43   : > { %933 = vmatmul.msk.bf16.gmra.mxu0 %vm388_vm1, %v967_v14 }
  0x44   : > { %941 = vmatmul.msk.bf16.gmra.mxu1 %vm388_vm1, %v975_v15 }
  0x45   : > { %949 = vmatmul.msk.bf16.gmra.mxu2 %vm388_vm1, %v983_v16 }
  0x46   : > { %957 = vmatmul.msk.bf16.gmra.mxu3 %vm388_vm1, %v991_v17 }
  0x53   : > { %934 = vmatmul.msk.bf16.gmra.mxu0 %vm388_vm1, %v968_v18 }
  0x54   : > { %942 = vmatmul.msk.bf16.gmra.mxu1 %vm388_vm1, %v976_v19 }
  0x55   : > { %950 = vmatmul.msk.bf16.gmra.mxu2 %vm388_vm1, %v984_v20 }
  0x56   : > { %958 = vmatmul.msk.bf16.gmra.mxu3 %vm388_vm1, %v992_v21 }
  0x63   : > { %935 = vmatmul.msk.bf16.gmra.mxu0 %vm388_vm1, %v969_v22 }
  0x64   : > { %943 = vmatmul.msk.bf16.gmra.mxu1 %vm388_vm1, %v977_v23 }
  0x65   : > { %951 = vmatmul.msk.bf16.gmra.mxu2 %vm388_vm1, %v985_v24 }
  0x66   : > { %959 = vmatmul.msk.bf16.gmra.mxu3 %vm388_vm1, %v993_v25 }
  0x73   : > { %936 = vmatmul.msk.bf16.gmra.mxu0 %vm388_vm1, %v970_v26 }
  0x74   : > { %944 = vmatmul.msk.bf16.gmra.mxu1 %vm388_vm1, %v978_v27 }
  0x75   : > { %952 = vmatmul.msk.bf16.gmra.mxu2 %vm388_vm1, %v986_v28 }
  0x76   : > { %960 = vmatmul.msk.bf16.gmra.mxu3 %vm388_vm1, %v994_v29 }
  0x83   : > { %937 = vmatmul.msk.bf16.gmra.mxu0 %vm388_vm1, %v971_v30 }
  0x84   : > { %945 = vmatmul.msk.bf16.gmra.mxu1 %vm388_vm1, %v979_v31 }
  0x85   : > { %953 = vmatmul.msk.bf16.gmra.mxu2 %vm388_vm1, %v987_v32 }
  0x86   : > { %961 = vmatmul.msk.bf16.gmra.mxu3 %vm388_vm1, %v995_v33 }
  0x90   : > { %v498_v34 = vpop.f32.mrf.mxu0 }
  0x91   : > { %v538_v35 = vpop.f32.mrf.mxu1  ;;  %659 = vst.msk [vmem:[%s1163_s24] sm:$0xff] %vm658_vm2, %v498_v34 }
  0x92   : > { %675 = vst.msk [vmem:[%s1163_s24 + $0x80] sm:$0xff] %vm658_vm2, %v538_v35 }
  0x98   : > { %v578_v36 = vpop.f32.mrf.mxu2  ;;  %v500_v38 = vpop.f32.mrf.mxu0 }
  0x99   : > { %v618_v37 = vpop.f32.mrf.mxu3  ;;  %691 = vst.msk [vmem:[%s1163_s24 + $0x100] sm:$0xff] %vm658_vm2, %v578_v36  ;;  %v540_v39 = vpop.f32.mrf.mxu1 }
  0x9a   : > { %707 = vst.msk [vmem:[%s1163_s24 + $0x180] sm:$0xff] %vm658_vm2, %v618_v37 }
  0x9b   : > { %660 = vst.msk [vmem:[%s1163_s24 + $0x8] sm:$0xff] %vm658_vm2, %v500_v38 }
  0x9c   : > { %676 = vst.msk [vmem:[%s1163_s24 + $0x88] sm:$0xff] %vm658_vm2, %v540_v39 }
  0xa0   : > { %v580_v40 = vpop.f32.mrf.mxu2  ;;  %v503_v42 = vpop.f32.mrf.mxu0 }
  0xa1   : > { %v620_v41 = vpop.f32.mrf.mxu3  ;;  %692 = vst.msk [vmem:[%s1163_s24 + $0x108] sm:$0xff] %vm658_vm2, %v580_v40  ;;  %v543_v43 = vpop.f32.mrf.mxu1 }
  0xa2   : > { %708 = vst.msk [vmem:[%s1163_s24 + $0x188] sm:$0xff] %vm658_vm2, %v620_v41 }
  0xa3   : > { %661 = vst.msk [vmem:[%s1163_s24 + $0x10] sm:$0xff] %vm658_vm2, %v503_v42 }
  0xa4   : > { %677 = vst.msk [vmem:[%s1163_s24 + $0x90] sm:$0xff] %vm658_vm2, %v543_v43 }
  0xa8   : > { %v583_v44 = vpop.f32.mrf.mxu2  ;;  %v505_v46 = vpop.f32.mrf.mxu0 }
  0xa9   : > { %v623_v45 = vpop.f32.mrf.mxu3  ;;  %693 = vst.msk [vmem:[%s1163_s24 + $0x110] sm:$0xff] %vm658_vm2, %v583_v44  ;;  %v545_v47 = vpop.f32.mrf.mxu1 }
  0xaa   : > { %709 = vst.msk [vmem:[%s1163_s24 + $0x190] sm:$0xff] %vm658_vm2, %v623_v45 }
  0xab   : > { %662 = vst.msk [vmem:[%s1163_s24 + $0x18] sm:$0xff] %vm658_vm2, %v505_v46 }
  0xac   : > { %678 = vst.msk [vmem:[%s1163_s24 + $0x98] sm:$0xff] %vm658_vm2, %v545_v47 }
  0xb0   : > { %v585_v48 = vpop.f32.mrf.mxu2  ;;  %v508_v50 = vpop.f32.mrf.mxu0 }
  0xb1   : > { %v625_v49 = vpop.f32.mrf.mxu3  ;;  %694 = vst.msk [vmem:[%s1163_s24 + $0x118] sm:$0xff] %vm658_vm2, %v585_v48  ;;  %v548_v51 = vpop.f32.mrf.mxu1 }
  0xb2   : > { %710 = vst.msk [vmem:[%s1163_s24 + $0x198] sm:$0xff] %vm658_vm2, %v625_v49 }
  0xb3   : > { %663 = vst.msk [vmem:[%s1163_s24 + $0x20] sm:$0xff] %vm658_vm2, %v508_v50 }
  0xb4   : > { %679 = vst.msk [vmem:[%s1163_s24 + $0xa0] sm:$0xff] %vm658_vm2, %v548_v51 }
  0xb8   : > { %v588_v52 = vpop.f32.mrf.mxu2  ;;  %v510_v54 = vpop.f32.mrf.mxu0 }
  0xb9   : > { %v628_v53 = vpop.f32.mrf.mxu3  ;;  %695 = vst.msk [vmem:[%s1163_s24 + $0x120] sm:$0xff] %vm658_vm2, %v588_v52  ;;  %v550_v55 = vpop.f32.mrf.mxu1 }
  0xba   : > { %711 = vst.msk [vmem:[%s1163_s24 + $0x1a0] sm:$0xff] %vm658_vm2, %v628_v53 }
  0xbb   : > { %664 = vst.msk [vmem:[%s1163_s24 + $0x28] sm:$0xff] %vm658_vm2, %v510_v54 }
  0xbc   : > { %680 = vst.msk [vmem:[%s1163_s24 + $0xa8] sm:$0xff] %vm658_vm2, %v550_v55 }
  0xc0   : > { %v590_v56 = vpop.f32.mrf.mxu2  ;;  %v513_v58 = vpop.f32.mrf.mxu0 }
  0xc1   : > { %v630_v57 = vpop.f32.mrf.mxu3  ;;  %696 = vst.msk [vmem:[%s1163_s24 + $0x128] sm:$0xff] %vm658_vm2, %v590_v56  ;;  %v553_v59 = vpop.f32.mrf.mxu1 }
  0xc2   : > { %712 = vst.msk [vmem:[%s1163_s24 + $0x1a8] sm:$0xff] %vm658_vm2, %v630_v57 }
  0xc3   : > { %665 = vst.msk [vmem:[%s1163_s24 + $0x30] sm:$0xff] %vm658_vm2, %v513_v58 }
  0xc4   : > { %681 = vst.msk [vmem:[%s1163_s24 + $0xb0] sm:$0xff] %vm658_vm2, %v553_v59 }
  0xc8   : > { %v593_v60 = vpop.f32.mrf.mxu2  ;;  %v515_v62 = vpop.f32.mrf.mxu0 }
  0xc9   : > { %v633_v61 = vpop.f32.mrf.mxu3  ;;  %697 = vst.msk [vmem:[%s1163_s24 + $0x130] sm:$0xff] %vm658_vm2, %v593_v60  ;;  %v555_v63 = vpop.f32.mrf.mxu1 }
  0xca   : > { %713 = vst.msk [vmem:[%s1163_s24 + $0x1b0] sm:$0xff] %vm658_vm2, %v633_v61 }
  0xcb   : > { %666 = vst.msk [vmem:[%s1163_s24 + $0x38] sm:$0xff] %vm658_vm2, %v515_v62 }
  0xcc   : > { %682 = vst.msk [vmem:[%s1163_s24 + $0xb8] sm:$0xff] %vm658_vm2, %v555_v63 }
  0xd0   : > { %v595_v0 = vpop.f32.mrf.mxu2  ;;  %v518_v2 = vpop.f32.mrf.mxu0 }
  0xd1   : > { %v635_v1 = vpop.f32.mrf.mxu3  ;;  %698 = vst.msk [vmem:[%s1163_s24 + $0x138] sm:$0xff] %vm658_vm2, %v595_v0  ;;  %v558_v3 = vpop.f32.mrf.mxu1 }
  0xd2   : > { %714 = vst.msk [vmem:[%s1163_s24 + $0x1b8] sm:$0xff] %vm658_vm2, %v635_v1 }
  0xd3   : > { %667 = vst.msk [vmem:[%s1163_s24 + $0x40] sm:$0xff] %vm658_vm2, %v518_v2 }
  0xd4   : > { %683 = vst.msk [vmem:[%s1163_s24 + $0xc0] sm:$0xff] %vm658_vm2, %v558_v3 }
  0xd8   : > { %v598_v4 = vpop.f32.mrf.mxu2  ;;  %v520_v6 = vpop.f32.mrf.mxu0 }
  0xd9   : > { %v638_v5 = vpop.f32.mrf.mxu3  ;;  %699 = vst.msk [vmem:[%s1163_s24 + $0x140] sm:$0xff] %vm658_vm2, %v598_v4  ;;  %v560_v7 = vpop.f32.mrf.mxu1 }
  0xda   : > { %715 = vst.msk [vmem:[%s1163_s24 + $0x1c0] sm:$0xff] %vm658_vm2, %v638_v5 }
  0xdb   : > { %668 = vst.msk [vmem:[%s1163_s24 + $0x48] sm:$0xff] %vm658_vm2, %v520_v6 }
  0xdc   : > { %684 = vst.msk [vmem:[%s1163_s24 + $0xc8] sm:$0xff] %vm658_vm2, %v560_v7 }
  0xe0   : > { %v600_v8 = vpop.f32.mrf.mxu2  ;;  %v523_v10 = vpop.f32.mrf.mxu0 }
  0xe1   : > { %v640_v9 = vpop.f32.mrf.mxu3  ;;  %700 = vst.msk [vmem:[%s1163_s24 + $0x148] sm:$0xff] %vm658_vm2, %v600_v8  ;;  %v563_v11 = vpop.f32.mrf.mxu1 }
  0xe2   : > { %716 = vst.msk [vmem:[%s1163_s24 + $0x1c8] sm:$0xff] %vm658_vm2, %v640_v9 }
  0xe3   : > { %669 = vst.msk [vmem:[%s1163_s24 + $0x50] sm:$0xff] %vm658_vm2, %v523_v10 }
  0xe4   : > { %685 = vst.msk [vmem:[%s1163_s24 + $0xd0] sm:$0xff] %vm658_vm2, %v563_v11 }
  0xe8   : > { %v603_v12 = vpop.f32.mrf.mxu2  ;;  %v525_v14 = vpop.f32.mrf.mxu0 }
  0xe9   : > { %v643_v13 = vpop.f32.mrf.mxu3  ;;  %701 = vst.msk [vmem:[%s1163_s24 + $0x150] sm:$0xff] %vm658_vm2, %v603_v12  ;;  %v565_v15 = vpop.f32.mrf.mxu1 }
  0xea   : > { %717 = vst.msk [vmem:[%s1163_s24 + $0x1d0] sm:$0xff] %vm658_vm2, %v643_v13 }
  0xeb   : > { %670 = vst.msk [vmem:[%s1163_s24 + $0x58] sm:$0xff] %vm658_vm2, %v525_v14 }
  0xec   : > { %686 = vst.msk [vmem:[%s1163_s24 + $0xd8] sm:$0xff] %vm658_vm2, %v565_v15 }
  0xf0   : > { %v605_v16 = vpop.f32.mrf.mxu2  ;;  %v528_v18 = vpop.f32.mrf.mxu0 }
  0xf1   : > { %v645_v17 = vpop.f32.mrf.mxu3  ;;  %702 = vst.msk [vmem:[%s1163_s24 + $0x158] sm:$0xff] %vm658_vm2, %v605_v16  ;;  %v568_v19 = vpop.f32.mrf.mxu1 }
  0xf2   : > { %718 = vst.msk [vmem:[%s1163_s24 + $0x1d8] sm:$0xff] %vm658_vm2, %v645_v17 }
  0xf3   : > { %671 = vst.msk [vmem:[%s1163_s24 + $0x60] sm:$0xff] %vm658_vm2, %v528_v18 }
  0xf4   : > { %687 = vst.msk [vmem:[%s1163_s24 + $0xe0] sm:$0xff] %vm658_vm2, %v568_v19 }
  0xf8   : > { %v608_v20 = vpop.f32.mrf.mxu2  ;;  %v530_v22 = vpop.f32.mrf.mxu0 }
  0xf9   : > { %v648_v21 = vpop.f32.mrf.mxu3  ;;  %703 = vst.msk [vmem:[%s1163_s24 + $0x160] sm:$0xff] %vm658_vm2, %v608_v20  ;;  %v570_v23 = vpop.f32.mrf.mxu1 }
  0xfa   : > { %719 = vst.msk [vmem:[%s1163_s24 + $0x1e0] sm:$0xff] %vm658_vm2, %v648_v21 }
  0xfb   : > { %672 = vst.msk [vmem:[%s1163_s24 + $0x68] sm:$0xff] %vm658_vm2, %v530_v22 }
  0xfc   : > { %688 = vst.msk [vmem:[%s1163_s24 + $0xe8] sm:$0xff] %vm658_vm2, %v570_v23 }
 0x100   : > { %v610_v24 = vpop.f32.mrf.mxu2  ;;  %v533_v26 = vpop.f32.mrf.mxu0 }
 0x101   : > { %v650_v25 = vpop.f32.mrf.mxu3  ;;  %704 = vst.msk [vmem:[%s1163_s24 + $0x168] sm:$0xff] %vm658_vm2, %v610_v24  ;;  %v573_v27 = vpop.f32.mrf.mxu1 }
 0x102   : > { %720 = vst.msk [vmem:[%s1163_s24 + $0x1e8] sm:$0xff] %vm658_vm2, %v650_v25 }
 0x103   : > { %673 = vst.msk [vmem:[%s1163_s24 + $0x70] sm:$0xff] %vm658_vm2, %v533_v26 }
 0x104   : > { %689 = vst.msk [vmem:[%s1163_s24 + $0xf0] sm:$0xff] %vm658_vm2, %v573_v27 }
 0x108   : > { %v613_v28 = vpop.f32.mrf.mxu2  ;;  %v535_v30 = vpop.f32.mrf.mxu0 }
 0x109   : > { %v653_v29 = vpop.f32.mrf.mxu3  ;;  %705 = vst.msk [vmem:[%s1163_s24 + $0x170] sm:$0xff] %vm658_vm2, %v613_v28  ;;  %v575_v31 = vpop.f32.mrf.mxu1 }
 0x10a   : > { %721 = vst.msk [vmem:[%s1163_s24 + $0x1f0] sm:$0xff] %vm658_vm2, %v653_v29 }
 0x10b   : > { %674 = vst.msk [vmem:[%s1163_s24 + $0x78] sm:$0xff] %vm658_vm2, %v535_v30 }
 0x10c   : > { %690 = vst.msk [vmem:[%s1163_s24 + $0xf8] sm:$0xff] %vm658_vm2, %v575_v31 }
 0x110   : > { %v615_v32 = vpop.f32.mrf.mxu2 }
 0x111   : > { %v655_v33 = vpop.f32.mrf.mxu3  ;;  %706 = vst.msk [vmem:[%s1163_s24 + $0x178] sm:$0xff] %vm658_vm2, %v615_v32 }
 0x112   : > { %722 = vst.msk [vmem:[%s1163_s24 + $0x1f8] sm:$0xff] %vm658_vm2, %v655_v33 }
 0x113 PF: > { %s13_s9 = sadd.s32 1, %s1058_s9  }
 0x114   : > { %p10_p7 = scmp.ge.s32.totalorder %s13_s9, 10  }
 0x116   :  { %12 = sbr.rel (!%p10_p7) target bundleno = 1 (0x1), region = 63 }
 0x11b   :  { %745 = vsyncpa [#allocation3], 1 }
 0x11c   :  { %747 = vsyncpa [#allocation3 + $0x1], 1 }

</bundles_post_ra>
